<compile_context>
chip_gen: v7x
topology: tpu7x:2x2x1
jax: 0.10.0
libtpu: 0.0.40
codegen_flags: <defaults>
</compile_context>

<pallas_src>
import jax
import jax.numpy as jnp
from jax.experimental import pallas as pl
from jax.experimental.pallas import tpu as pltpu

_EPS = 1e-15
_SUB, _LANE = 8, 128
_CHUNK = _SUB * _LANE          # elements per (8,128) vreg-shaped chunk
_MAX_TILE_CHUNKS = 256         # 256*1024 elems = 1 MiB f32 per input buffer
_P = 2                         # megacore split (harmless on 1-TC chips)


def _kaggle_log_loss_kernel(y_pred_ref, y_true_ref, out_ref):
    """Grid = (parallel_part, tile). Accumulate partial sums into out block."""
    t = pl.program_id(1)

    @pl.when(t == 0)
    def _():
        out_ref[...] = jnp.zeros_like(out_ref)

    # clamp -> log -> one-hot mask; in-kernel f32 cast (inputs stay native in HBM)
    p = jnp.clip(y_pred_ref[...].astype(jnp.float32), _EPS, 1.0 - _EPS)
    y = y_true_ref[...].astype(jnp.float32)
    # Sum over the leading (chunk) axis only: elementwise vreg adds (VPU),
    # no per-step cross-lane XLU reduction.
    out_ref[...] += jnp.sum(y * jnp.log(p), axis=0, keepdims=True)


def kaggle_log_loss(y_pred, y_true_one_hot):
    """y_pred: [B, C] float (f32/bf16), y_true_one_hot: [B, C] int/bool/float.

    Returns scalar f32 loss = -1/B * sum(y_true * log(clamp(y_pred))).
    """
    B, C = y_pred.shape
    assert y_true_one_hot.shape == (B, C)
    total = B * C

    # ---- lane-dense flatten + pad to a whole number of tiles ----
    n_chunks = -(-total // _CHUNK)
    tile_chunks = max(1, min(_MAX_TILE_CHUNKS, -(-n_chunks // _P)))
    tiles_total = -(-n_chunks // (tile_chunks * _P)) * _P   # multiple of _P
    tiles_per_part = tiles_total // _P
    padded_total = tiles_total * tile_chunks * _CHUNK

    p_flat = y_pred.reshape(-1)
    t_flat = y_true_one_hot.reshape(-1)
    pad = padded_total - total
    if pad:
        # pad y_true with 0 (contributes 0); y_pred pad value is irrelevant
        # (clamped to >= 1e-15, then multiplied by 0).
        p_flat = jnp.pad(p_flat, (0, pad))
        t_flat = jnp.pad(t_flat, (0, pad))
    p3 = p_flat.reshape(tiles_total * tile_chunks, _SUB, _LANE)
    t3 = t_flat.reshape(tiles_total * tile_chunks, _SUB, _LANE)

    in_map = lambda p, t: (p * tiles_per_part + t, 0, 0)

    partial = pl.pallas_call(
        _kaggle_log_loss_kernel,
        out_shape=jax.ShapeDtypeStruct((_P, _SUB, _LANE), jnp.float32),
        grid_spec=pltpu.PrefetchScalarGridSpec(
            num_scalar_prefetch=0,
            grid=(_P, tiles_per_part),
            in_specs=[
                pl.BlockSpec((tile_chunks, _SUB, _LANE), in_map),
                pl.BlockSpec((tile_chunks, _SUB, _LANE), in_map),
            ],
            out_specs=pl.BlockSpec((1, _SUB, _LANE), lambda p, t: (p, 0, 0)),
        ),
        compiler_params=pltpu.CompilerParams(
            dimension_semantics=("parallel", "arbitrary"),
        ),
    )(p3, t3)

    # tiny epilogue: cross-lane reduce of (P,8,128) partials, negate, mean
    return -(jnp.sum(partial) / jnp.float32(B))


def _reference(y_pred, y_true_one_hot):
    p = jnp.clip(y_pred.astype(jnp.float32), _EPS, 1.0 - _EPS)
    return -jnp.mean(jnp.sum(y_true_one_hot.astype(jnp.float32) * jnp.log(p), axis=1))


if __name__ == "__main__":
    B, C = 2, 4  # small shapes consistent with the [B, C] forward signature
    key = jax.random.PRNGKey(0)
    k1, k2 = jax.random.split(key)

    # probabilities (row-normalized, as a Kaggle submission would be), native f32
    logits = jax.random.normal(k1, (B, C), dtype=jnp.float32)
    y_pred = jax.nn.softmax(logits, axis=-1)

    # one-hot labels shipped as int8 (cheap HBM traffic; cast to f32 in-kernel)
    labels = jax.random.randint(k2, (B,), 0, C)
    y_true_one_hot = jax.nn.one_hot(labels, C, dtype=jnp.int8)

    loss = kaggle_log_loss(y_pred, y_true_one_hot)
    jax.block_until_ready(loss)

    ref = _reference(y_pred, y_true_one_hot)
    assert jnp.allclose(loss, ref, atol=1e-6, rtol=1e-6), (loss, ref)
    print("KERNEL_OK")
</pallas_src>

<mosaic_0001>
module attributes {stable_mosaic.version = 11 : i64} {
  func.func @_kaggle_log_loss_kernel(%arg0: i32, %arg1: i32, %arg2: memref<1x8x128xf32, #tpu.memory_space<vmem>>, %arg3: memref<1x8x128xi8, #tpu.memory_space<vmem>>, %arg4: memref<1x8x128xf32, #tpu.memory_space<vmem>>) attributes {dimension_semantics = [#tpu.dimension_semantics<parallel>, #tpu.dimension_semantics<arbitrary>], iteration_bounds = array<i64: 2, 1>, scalar_prefetch = 0 : i64, scratch_operands = 0 : i64, tpu.core_type = #tpu.core_type<tc>, window_params = [{transform_indices = @transform_0, window_bounds = array<i64: 1, 8, 128>}, {transform_indices = @transform_1, window_bounds = array<i64: 1, 8, 128>}, {transform_indices = @transform_2, window_bounds = array<i64: 1, 8, 128>}]} {
    %c0_i32 = arith.constant 0 : i32
    %0 = arith.cmpi eq, %arg1, %c0_i32 : i32
    %1 = arith.extui %0 : i1 to i32
    %c0_i32_0 = arith.constant 0 : i32
    %2 = arith.cmpi ne, %1, %c0_i32_0 : i32
    scf.if %2 {
      %cst_14 = arith.constant 0.000000e+00 : f32
      %17 = vector.broadcast %cst_14 : f32 to vector<1x8x128xf32>
      %c0_15 = arith.constant 0 : index
      %c0_16 = arith.constant 0 : index
      %c0_17 = arith.constant 0 : index
      %18 = vector.load %arg4[%c0_15, %c0_16, %c0_17] : memref<1x8x128xf32, #tpu.memory_space<vmem>>, vector<1x8x128xf32>
      tpu.vector_store %arg4[%c0_15, %c0_16, %c0_17], %17 {strides = array<i32>} : memref<1x8x128xf32, #tpu.memory_space<vmem>>, vector<1x8x128xf32>,
    } else {
    }
    %c0 = arith.constant 0 : index
    %c0_1 = arith.constant 0 : index
    %c0_2 = arith.constant 0 : index
    %3 = vector.load %arg2[%c0, %c0_1, %c0_2] : memref<1x8x128xf32, #tpu.memory_space<vmem>>, vector<1x8x128xf32>
    %cst = arith.constant 1.000000e-15 : f32
    %cst_3 = arith.constant 1.000000e+00 : f32
    %4 = vector.broadcast %cst : f32 to vector<1x8x128xf32>
    %5 = arith.maximumf %4, %3 : vector<1x8x128xf32>
    %6 = vector.broadcast %cst_3 : f32 to vector<1x8x128xf32>
    %7 = arith.minimumf %6, %5 : vector<1x8x128xf32>
    %c0_4 = arith.constant 0 : index
    %c0_5 = arith.constant 0 : index
    %c0_6 = arith.constant 0 : index
    %8 = vector.load %arg3[%c0_4, %c0_5, %c0_6] : memref<1x8x128xi8, #tpu.memory_space<vmem>>, vector<1x8x128xi8>
    %9 = arith.sitofp %8 : vector<1x8x128xi8> to vector<1x8x128xf32>
    %c0_7 = arith.constant 0 : index
    %c0_8 = arith.constant 0 : index
    %c0_9 = arith.constant 0 : index
    %10 = vector.load %arg4[%c0_7, %c0_8, %c0_9] : memref<1x8x128xf32, #tpu.memory_space<vmem>>, vector<1x8x128xf32>
    %11 = math.log %7 : vector<1x8x128xf32>
    %12 = arith.mulf %9, %11 : vector<1x8x128xf32>
    %cst_10 = arith.constant dense<0.000000e+00> : vector<8x128xf32>
    %13 = vector.multi_reduction <add>, %12, %cst_10 [0] : vector<1x8x128xf32> to vector<8x128xf32>
    %14 = vector.shape_cast %13 : vector<8x128xf32> to vector<1x8x128xf32>
    %15 = arith.addf %10, %14 : vector<1x8x128xf32>
    %c0_11 = arith.constant 0 : index
    %c0_12 = arith.constant 0 : index
    %c0_13 = arith.constant 0 : index
    %16 = vector.load %arg4[%c0_11, %c0_12, %c0_13] : memref<1x8x128xf32, #tpu.memory_space<vmem>>, vector<1x8x128xf32>
    tpu.vector_store %arg4[%c0_11, %c0_12, %c0_13], %15 {strides = array<i32>} : memref<1x8x128xf32, #tpu.memory_space<vmem>>, vector<1x8x128xf32>,
    return
  }
  func.func @transform_0(%arg0: i32, %arg1: i32) -> (i32, i32, i32) {
    %c1_i32 = arith.constant 1 : i32
    %0 = arith.muli %arg0, %c1_i32 : i32
    %1 = arith.addi %0, %arg1 : i32
    %c0_i32 = arith.constant 0 : i32
    %c0_i32_0 = arith.constant 0 : i32
    %c0_i32_1 = arith.constant 0 : i32
    return %1, %c0_i32, %c0_i32_0 : i32, i32, i32
  }
  func.func @transform_1(%arg0: i32, %arg1: i32) -> (i32, i32, i32) {
    %c1_i32 = arith.constant 1 : i32
    %0 = arith.muli %arg0, %c1_i32 : i32
    %1 = arith.addi %0, %arg1 : i32
    %c0_i32 = arith.constant 0 : i32
    %c0_i32_0 = arith.constant 0 : i32
    %c0_i32_1 = arith.constant 0 : i32
    return %1, %c0_i32, %c0_i32_0 : i32, i32, i32
  }
  func.func @transform_2(%arg0: i32, %arg1: i32) -> (i32, i32, i32) {
    %c0_i32 = arith.constant 0 : i32
    %c0_i32_0 = arith.constant 0 : i32
    %c0_i32_1 = arith.constant 0 : i32
    return %arg0, %c0_i32, %c0_i32_0 : i32, i32, i32
  }
}

</mosaic_0001>

<bundles_post_ra>
// kernel: tpu_custom_call.1
= control target key start
LH: loop header
LB: loop body
LE: loop exit
PB: predicated region body
PF: predicated region fallthrough
CT: control target
= control target key end

     0   :  { %7 = vsyncpa [#allocation3], 0  ;;  %s818_s0 = inlined_call_operand.hbm [shape: f32[2,8,128], index: 0, kind: input, shape index: {}]   ;;  %s819_s1 = inlined_call_operand.hbm [shape: s8[2,8,128], index: 1, kind: input, shape index: {}]   ;;  %s820_s2 = inlined_call_operand.hbm [shape: f32[2,8,128], index: 2, kind: output, shape index: {}]  }
   0x1   :  { %9 = vsyncpa [#allocation3 + $0x1], 0 }
   0x2   :  { %10 = vsyncpa [#allocation6], 0 }
   0x3   :  { %12 = vsyncpa [#allocation6 + $0x1], 0 }
   0x4   :  { %13 = vsyncpa [#allocation4], 0 }
   0x5   :  { %15 = vsyncpa [#allocation4 + $0x1], 0  ;;  %s603_s9 = smov 0   ;;  %s605_s10 = smov 0  }
   0x6   :  { %s607_s11 = smov 0   ;;  %s609_s12 = smov 0  }
   0x7   :  { %s611_s13 = smov 0   ;;  %s613_s14 = smov 0  }
   0x8 LB: > { %s351_s15 = sadd.s32 4294967295, %s583_s14   ;;  %s352_s16 = sadd.s32 4294967294, %s583_s14   ;;  %s583_s14 = sphi %s613_s14, %s21_s14   ;;  %s579_s13 = sphi %s611_s13, %s840_s13   ;;  %s575_s12 = sphi %s609_s12, %s839_s12   ;;  %s571_s11 = sphi %s607_s11, %s838_s11   ;;  %s567_s10 = sphi %s605_s10, %s837_s10   ;;  %s563_s9 = sphi %s603_s9, %s836_s9  }
   0x9   : > { %s33_s17 = sadd.s32 1, %s579_s13  ;;  %s42_s18 = sadd.s32 1, %s571_s11 }
   0xa   : > { %p35_p0 = scmp.ge.s32.totalorder %s33_s17, 2  ;;  %p49_p1 = scmp.ne.s32.totalorder %s571_s11, %s567_s10 }
   0xb   : > { %p50_p2 = scmp.eq.s32.totalorder %s583_s14, 0  ;;  %p55_p3 = scmp.ne.s32.totalorder %s567_s10, %s563_s9 }
   0xc   : > { %s842_s17 = smov (%p35_p0, %s33_s17), 0  ;;  %p56_p5 = scmp.eq.s32.totalorder %s351_s15, 0 }
   0xd   : > { %p644_p4 = por %p50_p2, %p49_p1  ;;  %s39_s20 = ssub.s32 %s579_s13, %s842_s17 }
   0xe   : > { %p107_p6 = scmp.eq.s32.totalorder %s351_s15, 1  ;;  %p40_p7 = scmp.eq.s32.totalorder %s39_s20, 0 }
   0xf   : > { %p650_p8 = por %p56_p5, %p55_p3  ;;  %p113_p10 = scmp.eq.s32.totalorder %s352_s16, 1 }
  0x10   : > { %p654_p9 = por %p107_p6, %p49_p1  ;;  %p384_p13 = scmp.lt.s32.totalorder %s583_s14, 2 }
  0x11   : > { %s824_s21 = scalar_select %p650_p8, 1, 0 }
  0x12   : > { %s825_s22 = scalar_select %p654_p9, 1, 0 }
  0x13   : > { %s659_s23 = scalar_select %p40_p7, %s571_s11, %s42_s18  }
  0x14   : > { %p661_p11 = por %p113_p10, %p55_p3  ;;  %s668_s25 = sand.u32 1, %s571_s11  }
  0x15   : > { %s355_s26 = sshll.u32 %s668_s25, 3  ;;  %s356_s27 = sshll.u32 %s579_s13, 7 }
  0x16   : > { %s826_s24 = scalar_select %p661_p11, 1, 0 }
  0x17   : > { %s675_s30 = scalar_lea.hbm %s818_s0, %s356_s27  ;;  %s137_s3 = scalar_lea.vmem [#allocation2], %s355_s26 }
  0x18   : > { %s145_s4 = sshll.u32 %s137_s3, 4  ;;  %p681_p0 = pnand %p384_p13, %p644_p4  ;;  %s677_s4 = int_to_ptr.vmem [resolvable:$true] %s145_s4 }
  0x19   : > { %s134_s6 = scalar_lea.sflag [#allocation3], %s668_s25  ;;  %s437_s7 = scalar_lea.hbm %s675_s30, 128 }
  0x1a   : > { %p438_p3 = scmp.ne.s32.totalorder %s675_s30, %s437_s7  ;;  %p439_p5 = pneg %p681_p0 }
  0x1b   : > { %s442_s16 = scalar_lea.hbm %s818_s0, 256  ;;  %p443_p4 = scmp.lt.u32.totalorder %s675_s30, %s818_s0 }
  0x1c   : > { %p440_p6 = pnand %p439_p5, %p438_p3  ;;  %p444_p10 = scmp.lt.u32.totalorder %s442_s16, %s437_s7 }
  0x1d   : > { %p446_p12 = scmp.lt.u32.totalorder %s437_s7, %s675_s30 }
  0x1e   : > { %p441_p7 = pneg %p440_p6  ;;  %p445_p13 = por %p444_p10, %p443_p4 }
  0x20   : > { %p447_p1 = por %p446_p12, %p445_p13 }
  0x22   : > { %p448_p2 = pnand %p447_p1, %p441_p7 }
  0x24   : > { %451 = shalt.err (!%p448_p2)
}
  0x25   : > { %s452_s20 = scalar_lea.vmem %s677_s4, 128  ;;  %s585_s26 = smov [#allocation2]  }
  0x26   : > { %p453_p3 = scmp.ne.s32.totalorder %s677_s4, %s452_s20  ;;  %s457_s27 = sshll.u32 %s585_s26, 4  ;;  %s458_s27 = int_to_ptr.vmem [resolvable:$false] %s457_s27 }
  0x27   : > { %s459_s28 = scalar_lea.vmem %s458_s27, 256  ;;  %p460_p9 = scmp.lt.s32.totalorder %s677_s4, %s458_s27 }
  0x28   : > { %p455_p6 = pnand %p453_p3, %p439_p5  ;;  %p461_p4 = scmp.lt.s32.totalorder %s459_s28, %s452_s20 }
  0x2a   : > { %p456_p11 = pneg %p455_p6  ;;  %p462_p10 = por %p461_p4, %p460_p9 }
  0x2c   : > { %p463_p12 = pnand %p462_p10, %p456_p11 }
  0x2e   : > { %466 = shalt.err (!%p463_p12)
}
  0x2f   : > { %376 = dma.hbm_to_vmem [thread:$0]  (!%p681_p0), %s675_s30, 128, %s677_s4, %s134_s6  }
  0x30   : > { %p828_p1 = scmp.lt.s32.totalorder %s583_s14, 3  ;;  %p829_p2 = scmp.ge.s32.totalorder %s583_s14, 1 }
  0x31   : > { %s357_s3 = sshll.u32 %s668_s25, 1  ;;  %s358_s7 = sshll.u32 %s579_s13, 5 }
  0x32   : > { %p717_p7 = pnand %p829_p2, %p828_p1  ;;  %s726_s16 = scalar_lea.hbm %s819_s1, %s358_s7 }
  0x33   : > { %s156_s18 = scalar_lea.vmem [#allocation5], %s357_s3  ;;  %s153_s30 = scalar_lea.sflag [#allocation6], %s668_s25 }
  0x34   : > { %s830_s29 = scalar_select %p717_p7, 1, 0 }
  0x35   : > { %s164_s19 = sshll.u32 %s156_s18, 4  ;;  %s467_s4 = scalar_lea.hbm %s726_s16, 32  ;;  %s165_s19 = int_to_ptr.vmem [resolvable:$true] %s164_s19 }
  0x36   : > { %p468_p9 = scmp.ne.s32.totalorder %s726_s16, %s467_s4  ;;  %s472_s26 = scalar_lea.hbm %s819_s1, 64 }
  0x37   : > { %p473_p3 = scmp.lt.u32.totalorder %s726_s16, %s819_s1  ;;  %p474_p6 = scmp.lt.u32.totalorder %s472_s26, %s467_s4 }
  0x38   : > { %p470_p11 = pnand %p468_p9, %p439_p5  ;;  %p476_p10 = scmp.lt.u32.totalorder %s467_s4, %s726_s16 }
  0x39   : > { %p475_p4 = por %p474_p6, %p473_p3 }
  0x3a   : > { %p471_p13 = pneg %p470_p11 }
  0x3b   : > { %p477_p12 = por %p476_p10, %p475_p4 }
  0x3d   : > { %p478_p1 = pnand %p477_p12, %p471_p13 }
  0x3f   : > { %481 = shalt.err (!%p478_p1)
}
  0x40   : > { %s482_s25 = scalar_lea.vmem %s165_s19, 32  ;;  %s586_s3 = smov [#allocation5]  }
  0x41   : > { %p483_p2 = scmp.ne.s32.totalorder %s165_s19, %s482_s25  ;;  %s487_s7 = sshll.u32 %s586_s3, 4  ;;  %s488_s7 = int_to_ptr.vmem [resolvable:$false] %s487_s7 }
  0x42   : > { %s489_s8 = scalar_lea.vmem %s488_s7, 64  ;;  %p490_p8 = scmp.lt.s32.totalorder %s165_s19, %s488_s7 }
  0x43   : > { %p485_p9 = pnand %p483_p2, %p439_p5  ;;  %p491_p7 = scmp.lt.s32.totalorder %s489_s8, %s482_s25 }
  0x45   : > { %p486_p11 = pneg %p485_p9  ;;  %p492_p3 = por %p491_p7, %p490_p8 }
  0x47   : > { %p493_p6 = pnand %p492_p3, %p486_p11 }
  0x49   : > { %496 = shalt.err (!%p493_p6)
}
  0x4a   : > { %379 = dma.hbm_to_vmem [thread:$0]  (!%p681_p0), %s726_s16, 32, %s165_s19, %s153_s30  }
  0x4b   : > { %p831_p13 = scmp.ne.s32.totalorder %s830_s29, 0 }
  0x4c   : > { %s751_s15 = sand.u32 (!%p831_p13), 1, %s567_s10   ;;  %p832_p5 = scmp.ne.s32.totalorder (!%p831_p13), %s824_s21, 0 }
  0x4d   : > { %173 = sbr.rel (%p831_p13) target bundleno = 122 (0x7a), region = 28  ;;  %s360_s18 = sshll.u32 (!%p831_p13), %s751_s15, 3 }
  0x4e   : > { %s176_s4 = scalar_lea.sflag (!%p831_p13), [#allocation3], %s751_s15  ;;  %s179_s6 = scalar_lea.vmem (!%p831_p13), [#allocation2], %s360_s18 }
  0x54   : > { %550 = dma.done.wait (%p832_p5), %s176_s4, 128  }
  0x55   : > { %552 = vsyncadd (%p832_p5), %s176_s4, 4294967168  ;;  %s361_s5 = sshll.u32 %s751_s15, 1  ;;  %s185_s29 = scalar_lea.sflag [#allocation6], %s751_s15 }
  0x56   : > { %s188_s16 = scalar_lea.vmem [#allocation5], %s361_s5 }
  0x57   : > { %554 = dma.done.wait (%p832_p5), %s185_s29, 32  }
  0x58   : > { %556 = vsyncadd (%p832_p5), %s185_s29, 4294967264  ;;  %v221_v0 = vld [vmem:[%s179_s6] sm:$0xff]  ;;  %v224_v3 = vld [vmem:[%s188_s16] sm:$0x3]  ;;  %s364_s19 = sshll.u32 %s575_s12, 7  ;;  %s213_s30 = scalar_lea.vmem [#allocation7], %s360_s18 }
  0x59   : > { %v222_v1 = vmax.f32 %v221_v0, 1e-15  ;;  %v225_v4 = vunpack.c.0.s8 %v224_v3  ;;  %s248_s20 = sshll.u32 %s213_s30, 4  ;;  %s769_s21 = scalar_lea.hbm %s820_s2, %s364_s19  ;;  %s771_s20 = int_to_ptr.vmem [resolvable:$true] %s248_s20 }
  0x5a   : > { %s235_s28 = scalar_lea.sflag [#allocation4], %s751_s15  ;;  %s497_s25 = scalar_lea.vmem %s771_s20, 128 }
  0x5b   : > { %v223_v2 = vmin.f32 %v222_v1, 1.0  ;;  %v226_v5 = vcvt.s32.f32 %v225_v4  ;;  %p498_p8 = scmp.ne.s32.totalorder %s771_s20, %s497_s25  ;;  %p833_p0 = scmp.ne.s32.totalorder %s825_s22, 0 }
  0x5c   : > { %s587_s12 = smov [#allocation7]  }
  0x5d   : > { %435 = vlog2.f32 %v223_v2  ;;  %p499_p7 = pnand %p498_p8, %p833_p0  ;;  %s501_s3 = sshll.u32 %s587_s12, 4  ;;  %s502_s3 = int_to_ptr.vmem [resolvable:$false] %s501_s3 }
  0x5e   : > { %s503_s7 = scalar_lea.vmem %s502_s3, 256  ;;  %p504_p10 = scmp.lt.s32.totalorder %s771_s20, %s502_s3 }
  0x5f   : > { %p500_p4 = pneg %p499_p7  ;;  %p505_p12 = scmp.lt.s32.totalorder %s503_s7, %s497_s25 }
  0x61   : > { %p506_p1 = por %p505_p12, %p504_p10 }
  0x63   : > { %p507_p2 = pnand %p506_p1, %p500_p4 }
  0x67   : > { %v436_v6 = vpop.eup %435 }
  0x68   : > { %v229_v7 = vmul.f32 0.6931472, %v436_v6 }
  0x6a   : > { %v230_v8 = vmul.f32 %v229_v7, %v226_v5 }
  0x6c   : > { %233 = vst [vmem:[%s213_s30] sm:$0xff] %v230_v8 }
  0x6d   : > { %510 = shalt.err (!%p507_p2)
}
  0x6e   : > { %s511_s8 = scalar_lea.hbm %s769_s21, 128  ;;  %s515_s4 = scalar_lea.hbm %s820_s2, 256 }
  0x6f   : > { %p512_p9 = scmp.ne.s32.totalorder %s769_s21, %s511_s8  ;;  %p516_p6 = scmp.lt.u32.totalorder %s769_s21, %s820_s2 }
  0x70   : > { %p517_p13 = scmp.lt.u32.totalorder %s515_s4, %s511_s8  ;;  %p519_p8 = scmp.lt.u32.totalorder %s511_s8, %s769_s21 }
  0x71   : > { %p513_p11 = pnand %p512_p9, %p833_p0 }
  0x72   : > { %p518_p5 = por %p517_p13, %p516_p6 }
  0x73   : > { %p514_p3 = pneg %p513_p11 }
  0x74   : > { %p520_p7 = por %p519_p8, %p518_p5 }
  0x76   : > { %p521_p4 = pnand %p520_p7, %p514_p3 }
  0x78   : > { %524 = shalt.err (!%p521_p4)
}
  0x79   : > { %371 = dma.vmem_to_hbm [thread:$0]  (%p833_p0), %s771_s20, 128, %s769_s21, %s235_s28  }
  0x7a PF: > { %s260_s29 = sand.u32 1, %s563_s9   ;;  %p834_p10 = scmp.ne.s32.totalorder %s826_s24, 0 }
  0x7b   : > { %p835_p12 = scmp.ge.s32.totalorder %s583_s14, 2  ;;  %s261_s16 = scalar_lea.sflag [#allocation4], %s260_s29 }
  0x7d   : > { %p381_p1 = pnand %p835_p12, %p834_p10 }
  0x7f   : > { %558 = dma.done.wait (!%p381_p1), %s261_s16, 128  }
  0x80   : > { %560 = vsyncadd (!%p381_p1), %s261_s16, 4294967168  ;;  %s21_s14 = sadd.s32 1, %s583_s14   ;;  %s836_s9 = smov %s567_s10 }
  0x81   : > { %p18_p2 = scmp.ge.s32.totalorder %s21_s14, 4   ;;  %s837_s10 = smov %s571_s11 }
  0x82   : > { %s838_s11 = smov %s659_s23  ;;  %s839_s12 = smov %s579_s13 }
  0x83   : > { %s840_s13 = smov %s842_s17  ;;  %20 = sbr.rel (!%p18_p2) target bundleno = 8 (0x8), region = 90 }
  0x8a   :  { %266 = vsyncpa [#allocation3], 1 }
  0x8b   :  { %268 = vsyncpa [#allocation3 + $0x1], 1 }
  0x8c   :  { %269 = vsyncpa [#allocation6], 1 }
  0x8d   :  { %271 = vsyncpa [#allocation6 + $0x1], 1 }
  0x8e   :  { %272 = vsyncpa [#allocation4], 1 }
  0x8f   :  { %274 = vsyncpa [#allocation4 + $0x1], 1 }

</bundles_post_ra>
